<compile_context>
chip_gen: v7x
topology: tpu7x:2x2x1
jax: 0.10.0
libtpu: 0.0.40
codegen_flags: <defaults>
</compile_context>

<pallas_src>
import functools

import jax
import jax.numpy as jnp
from jax.experimental import pallas as pl
from jax.experimental.pallas import tpu as pltpu


# ----------------------------------------------------------------------------
# Kernel 1: masked conv1d + per-block BN partial statistics
# ----------------------------------------------------------------------------
def _conv_stats_kernel(xlen_ref, x_ref, w_ref, conv_ref, stats_ref, xpad_ref, *,
                       pad, stride, dilation, K, B, use_im2col):
    i = pl.program_id(0)
    _, Cin, L = x_ref.shape                       # block (B, Cin, L)
    Cout = w_ref.shape[0]
    Lout = conv_ref.shape[2]
    Lout_s1 = L + 2 * pad - dilation * (K - 1)    # stride-1 output length

    # Zero only the 2*pad boundary columns, once per grid step (amortized over
    # the B folded batch items).  Cost: 2*pad*Cin elements.
    if pad > 0:
        xpad_ref[:, :pad] = jnp.zeros((Cin, pad), xpad_ref.dtype)
        xpad_ref[:, L + pad:] = jnp.zeros((Cin, pad), xpad_ref.dtype)

    w = w_ref[...]                                # (Cout, K*Cin), tap-major

    # stride > 1: strided output selection done on the MXU with a 0/1 matrix
    # (avoids lane-strided slices / XLU lane gathers).  Built once per step.
    if stride > 1:
        u = jax.lax.broadcasted_iota(jnp.int32, (Lout_s1, Lout), 0)
        t = jax.lax.broadcasted_iota(jnp.int32, (Lout_s1, Lout), 1)
        sel = (u == t * stride).astype(jnp.float32)

    t_idx = jax.lax.broadcasted_iota(jnp.int32, (Cin, L), 1)   # hoisted

    s_tot = jnp.zeros((Cout, 1), jnp.float32)
    for b in range(B):
        # ---- 1. mask positions t >= x_len (scalar-prefetch SMEM operand)
        x_len_b = xlen_ref[i * B + b]
        xm = jnp.where(t_idx < x_len_b, x_ref[b], 0.0).astype(xpad_ref.dtype)

        # ---- 2. padded scratch: interior written once per item
        xpad_ref[:, pad:pad + L] = xm

        # ---- 3. conv: single im2col matmul (small Cin) or K accumulating dots
        if use_im2col:
            xcol = jnp.concatenate(
                [xpad_ref[:, k * dilation:k * dilation + Lout_s1]
                 for k in range(K)], axis=0)                      # (K*Cin, Lout_s1)
            conv = jnp.dot(w, xcol, preferred_element_type=jnp.float32)
        else:
            conv = jnp.zeros((Cout, Lout_s1), jnp.float32)
            for k in range(K):
                tap = xpad_ref[:, k * dilation:k * dilation + Lout_s1]
                conv = conv + jnp.dot(w[:, k * Cin:(k + 1) * Cin], tap,
                                      preferred_element_type=jnp.float32)

        # ---- 4. stride handled on the MXU (selection matmul), not a lane slice
        if stride > 1:
            conv = jnp.dot(conv, sel, preferred_element_type=jnp.float32)

        conv_ref[b] = conv.astype(conv_ref.dtype)
        s_tot = s_tot + jnp.sum(conv, axis=-1, keepdims=True)

    # ---- 5. numerically robust partials: block-centered sum of squared
    # deviations (re-read from the VMEM conv block; combined across blocks
    # with Chan's parallel-variance formula in the wrapper).
    mean_blk = s_tot * (1.0 / (B * Lout))
    ssd_tot = jnp.zeros((Cout, 1), jnp.float32)
    for b in range(B):
        d = conv_ref[b].astype(jnp.float32) - mean_blk
        ssd_tot = ssd_tot + jnp.sum(d * d, axis=-1, keepdims=True)

    stats_ref[0] = jnp.concatenate([s_tot, ssd_tot], axis=-1)    # (Cout, 2)


# ----------------------------------------------------------------------------
# Kernel 2: fused per-channel scale-shift + ReLU (lane-dense tiles)
# ----------------------------------------------------------------------------
def _bn_relu_kernel(conv_ref, scale_ref, shift_ref, o_ref):
    y = conv_ref[...].astype(jnp.float32) * scale_ref[...] + shift_ref[...]
    o_ref[...] = jnp.maximum(y, 0.0).astype(o_ref.dtype)


# ----------------------------------------------------------------------------
# helpers
# ----------------------------------------------------------------------------
def _vmem_limit(bytes_needed):
    """Scoped VMEM request: footprint + headroom, capped below physical VMEM."""
    try:
        phys = int(pltpu.get_tpu_info().vmem_capacity_bytes)
    except Exception:
        phys = 64 << 20                      # assume the smallest (v7x) if unknown
    cap = min(max(phys - (16 << 20), 32 << 20), 100 << 20)
    return int(min(max(int(bytes_needed) + (4 << 20), 16 << 20), cap))


def _pick_fold(n, per_item_bytes, budget_bytes, min_steps=2):
    """Largest divisor B of n with B*per_item <= budget and n//B >= min_steps."""
    if n <= 1:
        return 1
    cap = max(1, budget_bytes // max(per_item_bytes, 1))
    cap = min(cap, max(1, n // max(min_steps, 1)))
    best = 1
    for d in range(1, n + 1):
        if d > cap:
            break
        if n % d == 0:
            best = d
    return best


# ----------------------------------------------------------------------------
# wrapper
# ----------------------------------------------------------------------------
def mask_conv_block_1d(x, x_len, weight, gamma, beta, *,
                       stride=1, padding=0, dilation=1, bn_eps=1e-5,
                       matmul_dtype=jnp.bfloat16, intermediate_dtype=None):
    """x: (N, C_in, L) f32; x_len: (N,) int; weight: (C_out, C_in, K) f32.

    matmul_dtype=bfloat16 (default) feeds the MXU bf16 operands with f32
    accumulation and stores the conv intermediate in bf16 (halves the HBM
    round-trip).  Pass matmul_dtype=jnp.float32 for strict f32 parity.
    """
    N, Cin, L = x.shape
    Cout, _, K = weight.shape
    Lout = (L + 2 * padding - dilation * (K - 1) - 1) // stride + 1
    Lout_s1 = L + 2 * padding - dilation * (K - 1)

    f32_mm = jnp.dtype(matmul_dtype) == jnp.dtype(jnp.float32)
    conv_dtype = (intermediate_dtype if intermediate_dtype is not None
                  else (jnp.float32 if f32_mm else jnp.bfloat16))
    conv_bpe = jnp.dtype(conv_dtype).itemsize
    mm_bpe = jnp.dtype(matmul_dtype).itemsize

    # tap-major im2col weight: W2[o, k*Cin + c] = w[o, c, k]
    w2 = jnp.transpose(weight, (0, 2, 1)).reshape(Cout, K * Cin).astype(matmul_dtype)

    # Accumulate-per-tap when the per-tap contraction already fills the MXU.
    use_im2col = Cin < 128

    # ---- kernel 1: batch folding picked from a VMEM budget, >=2 grid steps
    per_item1 = (2 * Cin * L * 4            # x block, double-buffered
                 + 2 * Cout * Lout * conv_bpe
                 + 2 * Cout * 2 * 4)
    B = _pick_fold(N, per_item1, 24 << 20, min_steps=2)
    nblk = N // B

    est_vmem1 = (B * per_item1
                 + 2 * Cout * K * Cin * mm_bpe          # weight (double-buffered)
                 + Cin * (L + 2 * padding) * mm_bpe)    # pad scratch
    flops1 = 2 * N * Cout * K * Cin * Lout_s1
    if stride > 1:
        flops1 += 2 * N * Cout * Lout_s1 * Lout
    bytes1 = (4 * N * Cin * L + conv_bpe * N * Cout * Lout
              + 4 * nblk * Cout * 2 + Cout * K * Cin * mm_bpe)

    kernel1 = functools.partial(_conv_stats_kernel, pad=padding, stride=stride,
                                dilation=dilation, K=K, B=B,
                                use_im2col=use_im2col)

    conv, stats = pl.pallas_call(
        kernel1,
        out_shape=(jax.ShapeDtypeStruct((N, Cout, Lout), conv_dtype),
                   jax.ShapeDtypeStruct((nblk, Cout, 2), jnp.float32)),
        grid_spec=pltpu.PrefetchScalarGridSpec(
            num_scalar_prefetch=1,
            grid=(nblk,),
            in_specs=[pl.BlockSpec((B, Cin, L), lambda i, xl: (i, 0, 0)),
                      pl.BlockSpec((Cout, K * Cin), lambda i, xl: (0, 0))],
            out_specs=[pl.BlockSpec((B, Cout, Lout), lambda i, xl: (i, 0, 0)),
                       pl.BlockSpec((1, Cout, 2), lambda i, xl: (i, 0, 0))],
            scratch_shapes=[pltpu.VMEM((Cin, L + 2 * padding), matmul_dtype)]),
        compiler_params=pltpu.CompilerParams(
            dimension_semantics=("parallel",),
            vmem_limit_bytes=_vmem_limit(est_vmem1)),
        cost_estimate=pl.CostEstimate(flops=int(flops1), transcendentals=0,
                                      bytes_accessed=int(bytes1)),
    )(x_len.astype(jnp.int32), x, w2)

    # ---- global BatchNorm statistics: Chan's parallel-variance combination of
    # per-block (sum, centered-SSD) partials -- no E[x^2]-E[x]^2 cancellation.
    n_blk = jnp.float32(B * Lout)
    n_tot = jnp.float32(N * Lout)
    s_k = stats[:, :, 0]                         # (nblk, Cout)
    ssd_k = stats[:, :, 1]                       # (nblk, Cout)
    mean = jnp.sum(s_k, axis=0) / n_tot
    m_k = s_k / n_blk
    ss = jnp.sum(ssd_k, axis=0) + jnp.sum(n_blk * (m_k - mean[None, :]) ** 2, axis=0)
    var = jnp.maximum(ss / n_tot, 0.0)           # biased variance
    scale = gamma * jax.lax.rsqrt(var + bn_eps)
    shift = beta - mean * scale

    # ---- kernel 2: tiled scale-shift-ReLU, lane-dense, batch-folded blocks
    TL = Lout if Lout <= 2048 else 2048
    ltiles = pl.cdiv(Lout, TL)
    per_item2 = 2 * Cout * TL * (conv_bpe + 4)
    B2 = _pick_fold(N, per_item2, 24 << 20, min_steps=2 if ltiles < 2 else 1)
    grid2 = (N // B2, ltiles)

    out_dtype = x.dtype
    alias = ({0: 0} if jnp.dtype(conv_dtype) == jnp.dtype(out_dtype) else {})

    out = pl.pallas_call(
        _bn_relu_kernel,
        out_shape=jax.ShapeDtypeStruct((N, Cout, Lout), out_dtype),
        grid=grid2,
        in_specs=[pl.BlockSpec((B2, Cout, TL), lambda i, j: (i, 0, j)),
                  pl.BlockSpec((1, Cout, 1), lambda i, j: (0, 0, 0)),
                  pl.BlockSpec((1, Cout, 1), lambda i, j: (0, 0, 0))],
        out_specs=pl.BlockSpec((B2, Cout, TL), lambda i, j: (i, 0, j)),
        compiler_params=pltpu.CompilerParams(
            dimension_semantics=("parallel", "parallel"),
            vmem_limit_bytes=_vmem_limit(B2 * per_item2 + 4 * Cout * 4)),
        input_output_aliases=alias,
        cost_estimate=pl.CostEstimate(
            flops=int(3 * N * Cout * Lout), transcendentals=0,
            bytes_accessed=int(N * Cout * Lout * (conv_bpe + 4) + 2 * Cout * 4)),
    )(conv, scale.reshape(1, Cout, 1), shift.reshape(1, Cout, 1))

    x_len_out = (x_len + 2 * padding - dilation * (K - 1) - 1) // stride + 1
    return out, x_len_out


# ----------------------------------------------------------------------------
# pure-JAX reference (matches PyTorch MaskConvBlock1d, train mode, groups=1)
# ----------------------------------------------------------------------------
def _reference(x, x_len, weight, gamma, beta, *, stride, padding, dilation, bn_eps):
    N, Cin, L = x.shape
    t_idx = jnp.arange(L)[None, None, :]
    xm = jnp.where(t_idx < x_len[:, None, None], x, 0.0)
    conv = jax.lax.conv_general_dilated(
        xm, weight, window_strides=(stride,), padding=[(padding, padding)],
        rhs_dilation=(dilation,), dimension_numbers=('NCH', 'OIH', 'NCH'))
    mean = conv.mean(axis=(0, 2), keepdims=True)
    var = ((conv - mean) ** 2).mean(axis=(0, 2), keepdims=True)
    y = (conv - mean) * jax.lax.rsqrt(var + bn_eps) * gamma[None, :, None] \
        + beta[None, :, None]
    return jnp.maximum(y, 0.0)


if __name__ == "__main__":
    # Small shapes consistent with the module (batch=4 so batch folding runs).
    N, Cin, Cout, L, K = 4, 4, 8, 16, 3
    bn_eps = 1e-5

    key = jax.random.PRNGKey(0)
    kx, kw, kg, kb = jax.random.split(key, 4)
    x = jax.random.normal(kx, (N, Cin, L), dtype=jnp.float32)
    x_len = jnp.array([16, 9, 12, 5], dtype=jnp.int32)
    weight = 0.3 * jax.random.normal(kw, (Cout, Cin, K), dtype=jnp.float32)
    gamma = 1.0 + 0.1 * jax.random.normal(kg, (Cout,), dtype=jnp.float32)
    beta = 0.1 * jax.random.normal(kb, (Cout,), dtype=jnp.float32)

    configs = [
        dict(stride=1, padding=1, dilation=1),   # typical "same"-style block
        dict(stride=2, padding=2, dilation=2),   # exercises stride/dilation path
    ]
    for cfg in configs:
        ref = _reference(x, x_len, weight, gamma, beta, bn_eps=bn_eps, **cfg)
        expected_len = (x_len + 2 * cfg["padding"]
                        - cfg["dilation"] * (K - 1) - 1) // cfg["stride"] + 1
        for mmdt, atol, rtol in ((jnp.float32, 1e-4, 1e-4),
                                 (jnp.bfloat16, 6e-2, 6e-2)):
            fn = jax.jit(functools.partial(mask_conv_block_1d, bn_eps=bn_eps,
                                           matmul_dtype=mmdt, **cfg))
            out, x_len_out = fn(x, x_len, weight, gamma, beta)
            out = jax.block_until_ready(out)
            assert out.shape == ref.shape, (out.shape, ref.shape)
            assert jnp.allclose(out, ref, atol=atol, rtol=rtol), \
                f"mismatch vs reference cfg={cfg} dtype={mmdt}"
            assert jnp.array_equal(x_len_out, expected_len), "x_len mismatch"

    print("KERNEL_OK")
</pallas_src>

<mosaic_0001>
module attributes {stable_mosaic.version = 11 : i64} {
  func.func @_conv_stats_kernel(%arg0: i32, %arg1: memref<4xi32, #tpu.memory_space<smem>>, %arg2: memref<2x4x16xf32, #tpu.memory_space<vmem>>, %arg3: memref<8x12xf32, #tpu.memory_space<vmem>>, %arg4: memref<2x8x16xf32, #tpu.memory_space<vmem>>, %arg5: memref<1x8x2xf32, #tpu.memory_space<vmem>>, %arg6: memref<4x18xf32, #tpu.memory_space<vmem>>) attributes {dimension_semantics = [#tpu.dimension_semantics<parallel>], iteration_bounds = array<i64: 2>, scalar_prefetch = 1 : i64, scratch_operands = 1 : i64, tpu.core_type = #tpu.core_type<tc>, window_params = [{transform_indices = @transform_0, window_bounds = array<i64: 2, 4, 16>}, {pipeline_mode = #tpu.pipeline_mode<synchronous>, transform_indices = @transform_1, window_bounds = array<i64: 8, 12>}, {transform_indices = @transform_2, window_bounds = array<i64: 2, 8, 16>}, {transform_indices = @transform_3, window_bounds = array<i64: 1, 8, 2>}]} {
    %cst = arith.constant 0.000000e+00 : f32
    %0 = vector.broadcast %cst : f32 to vector<4x1xf32>
    %c0 = arith.constant 0 : index
    %c0_0 = arith.constant 0 : index
    %1 = vector.load %arg6[%c0, %c0_0] : memref<4x18xf32, #tpu.memory_space<vmem>>, vector<4x1xf32>
    tpu.vector_store %arg6[%c0, %c0_0], %0 {strides = array<i32>} : memref<4x18xf32, #tpu.memory_space<vmem>>, vector<4x1xf32>,
    %cst_1 = arith.constant 0.000000e+00 : f32
    %2 = vector.broadcast %cst_1 : f32 to vector<4x1xf32>
    %c0_2 = arith.constant 0 : index
    %c17 = arith.constant 17 : index
    %3 = vector.load %arg6[%c0_2, %c17] : memref<4x18xf32, #tpu.memory_space<vmem>>, vector<4x1xf32>
    tpu.vector_store %arg6[%c0_2, %c17], %2 {strides = array<i32>} : memref<4x18xf32, #tpu.memory_space<vmem>>, vector<4x1xf32>,
    %c0_3 = arith.constant 0 : index
    %c0_4 = arith.constant 0 : index
    %4 = vector.load %arg3[%c0_3, %c0_4] : memref<8x12xf32, #tpu.memory_space<vmem>>, vector<8x12xf32>
    %5 = tpu.iota {dimensions = array<i32: 1>} : vector<4x16xi32>
    %cst_5 = arith.constant 0.000000e+00 : f32
    %6 = vector.broadcast %cst_5 : f32 to vector<8x1xf32>
    %c2_i32 = arith.constant 2 : i32
    %7 = arith.muli %arg0, %c2_i32 : i32
    %c0_i32 = arith.constant 0 : i32
    %8 = arith.addi %7, %c0_i32 : i32
    %9 = arith.index_cast %8 : i32 to index
    %10 = memref.load %arg1[%9] : memref<4xi32, #tpu.memory_space<smem>>
    %11 = vector.broadcast %10 : i32 to vector<4x16xi32>
    %12 = arith.cmpi slt, %5, %11 : vector<4x16xi32>
    %c0_6 = arith.constant 0 : index
    %c0_7 = arith.constant 0 : index
    %c0_8 = arith.constant 0 : index
    %13 = vector.load %arg2[%c0_6, %c0_7, %c0_8] : memref<2x4x16xf32, #tpu.memory_space<vmem>>, vector<1x4x16xf32>
    %14 = vector.shape_cast %13 : vector<1x4x16xf32> to vector<4x16xf32>
    %cst_9 = arith.constant 0.000000e+00 : f32
    %15 = vector.broadcast %cst_9 : f32 to vector<4x16xf32>
    %16 = arith.select %12, %14, %15 : vector<4x16xi1>, vector<4x16xf32>
    %c0_10 = arith.constant 0 : index
    %c1 = arith.constant 1 : index
    %17 = vector.load %arg6[%c0_10, %c1] : memref<4x18xf32, #tpu.memory_space<vmem>>, vector<4x16xf32>
    tpu.vector_store %arg6[%c0_10, %c1], %16 {strides = array<i32>} : memref<4x18xf32, #tpu.memory_space<vmem>>, vector<4x16xf32>,
    %c0_11 = arith.constant 0 : index
    %c0_12 = arith.constant 0 : index
    %18 = vector.load %arg6[%c0_11, %c0_12] : memref<4x18xf32, #tpu.memory_space<vmem>>, vector<4x16xf32>
    %c0_13 = arith.constant 0 : index
    %c1_14 = arith.constant 1 : index
    %19 = vector.load %arg6[%c0_13, %c1_14] : memref<4x18xf32, #tpu.memory_space<vmem>>, vector<4x16xf32>
    %c0_15 = arith.constant 0 : index
    %c2 = arith.constant 2 : index
    %20 = vector.load %arg6[%c0_15, %c2] : memref<4x18xf32, #tpu.memory_space<vmem>>, vector<4x16xf32>
    %21 = tpu.concatenate %18, %19, %20 in 0 : vector<4x16xf32>, vector<4x16xf32>, vector<4x16xf32> -> vector<12x16xf32>
    %cst_16 = arith.constant dense<0.000000e+00> : vector<8x16xf32>
    %22 = tpu.matmul %4, %21, %cst_16 {dimension_numbers = #tpu.dot_dimension_numbers<[1], [0], [0], [1], [0, 0, 1, 1], [], []>} : vector<8x12xf32>, vector<12x16xf32>, vector<8x16xf32> -> vector<8x16xf32>
    %c0_17 = arith.constant 0 : index
    %c0_18 = arith.constant 0 : index
    %c0_19 = arith.constant 0 : index
    %23 = vector.load %arg4[%c0_17, %c0_18, %c0_19] : memref<2x8x16xf32, #tpu.memory_space<vmem>>, vector<1x8x16xf32>
    %24 = vector.shape_cast %23 : vector<1x8x16xf32> to vector<8x16xf32>
    %25 = vector.shape_cast %22 : vector<8x16xf32> to vector<1x8x16xf32>
    tpu.vector_store %arg4[%c0_17, %c0_18, %c0_19], %25 {strides = array<i32>} : memref<2x8x16xf32, #tpu.memory_space<vmem>>, vector<1x8x16xf32>,
    %cst_20 = arith.constant dense<0.000000e+00> : vector<8xf32>
    %26 = vector.multi_reduction <add>, %22, %cst_20 [1] : vector<8x16xf32> to vector<8xf32>
    %27 = vector.shape_cast %26 : vector<8xf32> to vector<8x1xf32>
    %28 = arith.addf %6, %27 : vector<8x1xf32>
    %c2_i32_21 = arith.constant 2 : i32
    %29 = arith.muli %arg0, %c2_i32_21 : i32
    %c1_i32 = arith.constant 1 : i32
    %30 = arith.addi %29, %c1_i32 : i32
    %31 = arith.index_cast %30 : i32 to index
    %32 = memref.load %arg1[%31] : memref<4xi32, #tpu.memory_space<smem>>
    %33 = vector.broadcast %32 : i32 to vector<4x16xi32>
    %34 = arith.cmpi slt, %5, %33 : vector<4x16xi32>
    %c1_22 = arith.constant 1 : index
    %c0_23 = arith.constant 0 : index
    %c0_24 = arith.constant 0 : index
    %35 = vector.load %arg2[%c1_22, %c0_23, %c0_24] : memref<2x4x16xf32, #tpu.memory_space<vmem>>, vector<1x4x16xf32>
    %36 = vector.shape_cast %35 : vector<1x4x16xf32> to vector<4x16xf32>
    %cst_25 = arith.constant 0.000000e+00 : f32
    %37 = vector.broadcast %cst_25 : f32 to vector<4x16xf32>
    %38 = arith.select %34, %36, %37 : vector<4x16xi1>, vector<4x16xf32>
    %c0_26 = arith.constant 0 : index
    %c1_27 = arith.constant 1 : index
    %39 = vector.load %arg6[%c0_26, %c1_27] : memref<4x18xf32, #tpu.memory_space<vmem>>, vector<4x16xf32>
    tpu.vector_store %arg6[%c0_26, %c1_27], %38 {strides = array<i32>} : memref<4x18xf32, #tpu.memory_space<vmem>>, vector<4x16xf32>,
    %c0_28 = arith.constant 0 : index
    %c0_29 = arith.constant 0 : index
    %40 = vector.load %arg6[%c0_28, %c0_29] : memref<4x18xf32, #tpu.memory_space<vmem>>, vector<4x16xf32>
    %c0_30 = arith.constant 0 : index
    %c1_31 = arith.constant 1 : index
    %41 = vector.load %arg6[%c0_30, %c1_31] : memref<4x18xf32, #tpu.memory_space<vmem>>, vector<4x16xf32>
    %c0_32 = arith.constant 0 : index
    %c2_33 = arith.constant 2 : index
    %42 = vector.load %arg6[%c0_32, %c2_33] : memref<4x18xf32, #tpu.memory_space<vmem>>, vector<4x16xf32>
    %43 = tpu.concatenate %40, %41, %42 in 0 : vector<4x16xf32>, vector<4x16xf32>, vector<4x16xf32> -> vector<12x16xf32>
    %cst_34 = arith.constant dense<0.000000e+00> : vector<8x16xf32>
    %44 = tpu.matmul %4, %43, %cst_34 {dimension_numbers = #tpu.dot_dimension_numbers<[1], [0], [0], [1], [0, 0, 1, 1], [], []>} : vector<8x12xf32>, vector<12x16xf32>, vector<8x16xf32> -> vector<8x16xf32>
    %c1_35 = arith.constant 1 : index
    %c0_36 = arith.constant 0 : index
    %c0_37 = arith.constant 0 : index
    %45 = vector.load %arg4[%c1_35, %c0_36, %c0_37] : memref<2x8x16xf32, #tpu.memory_space<vmem>>, vector<1x8x16xf32>
    %46 = vector.shape_cast %45 : vector<1x8x16xf32> to vector<8x16xf32>
    %47 = vector.shape_cast %44 : vector<8x16xf32> to vector<1x8x16xf32>
    tpu.vector_store %arg4[%c1_35, %c0_36, %c0_37], %47 {strides = array<i32>} : memref<2x8x16xf32, #tpu.memory_space<vmem>>, vector<1x8x16xf32>,
    %cst_38 = arith.constant dense<0.000000e+00> : vector<8xf32>
    %48 = vector.multi_reduction <add>, %44, %cst_38 [1] : vector<8x16xf32> to vector<8xf32>
    %49 = vector.shape_cast %48 : vector<8xf32> to vector<8x1xf32>
    %50 = arith.addf %28, %49 : vector<8x1xf32>
    %cst_39 = arith.constant 3.125000e-02 : f32
    %51 = vector.broadcast %cst_39 : f32 to vector<8x1xf32>
    %52 = arith.mulf %50, %51 : vector<8x1xf32>
    %cst_40 = arith.constant 0.000000e+00 : f32
    %53 = vector.broadcast %cst_40 : f32 to vector<8x1xf32>
    %c0_41 = arith.constant 0 : index
    %c0_42 = arith.constant 0 : index
    %c0_43 = arith.constant 0 : index
    %54 = vector.load %arg4[%c0_41, %c0_42, %c0_43] : memref<2x8x16xf32, #tpu.memory_space<vmem>>, vector<1x8x16xf32>
    %55 = vector.shape_cast %54 : vector<1x8x16xf32> to vector<8x16xf32>
    %56 = vector.broadcast %52 : vector<8x1xf32> to vector<8x16xf32>
    %57 = arith.subf %55, %56 : vector<8x16xf32>
    %58 = arith.mulf %57, %57 : vector<8x16xf32>
    %cst_44 = arith.constant dense<0.000000e+00> : vector<8xf32>
    %59 = vector.multi_reduction <add>, %58, %cst_44 [1] : vector<8x16xf32> to vector<8xf32>
    %60 = vector.shape_cast %59 : vector<8xf32> to vector<8x1xf32>
    %61 = arith.addf %53, %60 : vector<8x1xf32>
    %c1_45 = arith.constant 1 : index
    %c0_46 = arith.constant 0 : index
    %c0_47 = arith.constant 0 : index
    %62 = vector.load %arg4[%c1_45, %c0_46, %c0_47] : memref<2x8x16xf32, #tpu.memory_space<vmem>>, vector<1x8x16xf32>
    %63 = vector.shape_cast %62 : vector<1x8x16xf32> to vector<8x16xf32>
    %64 = vector.broadcast %52 : vector<8x1xf32> to vector<8x16xf32>
    %65 = arith.subf %63, %64 : vector<8x16xf32>
    %66 = arith.mulf %65, %65 : vector<8x16xf32>
    %cst_48 = arith.constant dense<0.000000e+00> : vector<8xf32>
    %67 = vector.multi_reduction <add>, %66, %cst_48 [1] : vector<8x16xf32> to vector<8xf32>
    %68 = vector.shape_cast %67 : vector<8xf32> to vector<8x1xf32>
    %69 = arith.addf %61, %68 : vector<8x1xf32>
    %70 = tpu.concatenate %50, %69 in 1 : vector<8x1xf32>, vector<8x1xf32> -> vector<8x2xf32>
    %c0_49 = arith.constant 0 : index
    %c0_50 = arith.constant 0 : index
    %c0_51 = arith.constant 0 : index
    %71 = vector.load %arg5[%c0_49, %c0_50, %c0_51] : memref<1x8x2xf32, #tpu.memory_space<vmem>>, vector<1x8x2xf32>
    %72 = vector.shape_cast %71 : vector<1x8x2xf32> to vector<8x2xf32>
    %73 = vector.shape_cast %70 : vector<8x2xf32> to vector<1x8x2xf32>
    tpu.vector_store %arg5[%c0_49, %c0_50, %c0_51], %73 {strides = array<i32>} : memref<1x8x2xf32, #tpu.memory_space<vmem>>, vector<1x8x2xf32>,
    return
  }
  func.func @transform_0(%arg0: i32, %arg1: memref<4xi32, #tpu.memory_space<smem>>) -> (i32, i32, i32) {
    %c0_i32 = arith.constant 0 : i32
    %c0_i32_0 = arith.constant 0 : i32
    %c0_i32_1 = arith.constant 0 : i32
    return %arg0, %c0_i32, %c0_i32_0 : i32, i32, i32
  }
  func.func @transform_1(%arg0: i32, %arg1: memref<4xi32, #tpu.memory_space<smem>>) -> (i32, i32) {
    %c0_i32 = arith.constant 0 : i32
    %c0_i32_0 = arith.constant 0 : i32
    %c0_i32_1 = arith.constant 0 : i32
    return %c0_i32, %c0_i32_0 : i32, i32
  }
  func.func @transform_2(%arg0: i32, %arg1: memref<4xi32, #tpu.memory_space<smem>>) -> (i32, i32, i32) {
    %c0_i32 = arith.constant 0 : i32
    %c0_i32_0 = arith.constant 0 : i32
    %c0_i32_1 = arith.constant 0 : i32
    return %arg0, %c0_i32, %c0_i32_0 : i32, i32, i32
  }
  func.func @transform_3(%arg0: i32, %arg1: memref<4xi32, #tpu.memory_space<smem>>) -> (i32, i32, i32) {
    %c0_i32 = arith.constant 0 : i32
    %c0_i32_0 = arith.constant 0 : i32
    %c0_i32_1 = arith.constant 0 : i32
    return %arg0, %c0_i32, %c0_i32_0 : i32, i32, i32
  }
}

module attributes {stable_mosaic.version = 11 : i64} {
  func.func @_bn_relu_kernel(%arg0: i32, %arg1: i32, %arg2: memref<2x8x16xf32, #tpu.memory_space<vmem>>, %arg3: memref<1x8x1xf32, #tpu.memory_space<vmem>>, %arg4: memref<1x8x1xf32, #tpu.memory_space<vmem>>, %arg5: memref<2x8x16xf32, #tpu.memory_space<vmem>>) attributes {dimension_semantics = [#tpu.dimension_semantics<parallel>, #tpu.dimension_semantics<parallel>], iteration_bounds = array<i64: 2, 1>, scalar_prefetch = 0 : i64, scratch_operands = 0 : i64, tpu.core_type = #tpu.core_type<tc>, window_params = [{transform_indices = @transform_0, window_bounds = array<i64: 2, 8, 16>}, {pipeline_mode = #tpu.pipeline_mode<synchronous>, transform_indices = @transform_1, window_bounds = array<i64: 1, 8, 1>}, {pipeline_mode = #tpu.pipeline_mode<synchronous>, transform_indices = @transform_2, window_bounds = array<i64: 1, 8, 1>}, {transform_indices = @transform_3, window_bounds = array<i64: 2, 8, 16>}]} {
    %c0 = arith.constant 0 : index
    %c0_0 = arith.constant 0 : index
    %c0_1 = arith.constant 0 : index
    %0 = vector.load %arg2[%c0, %c0_0, %c0_1] : memref<2x8x16xf32, #tpu.memory_space<vmem>>, vector<2x8x16xf32>
    %c0_2 = arith.constant 0 : index
    %c0_3 = arith.constant 0 : index
    %c0_4 = arith.constant 0 : index
    %1 = vector.load %arg3[%c0_2, %c0_3, %c0_4] : memref<1x8x1xf32, #tpu.memory_space<vmem>>, vector<1x8x1xf32>
    %2 = vector.broadcast %1 : vector<1x8x1xf32> to vector<2x8x16xf32>
    %3 = arith.mulf %0, %2 : vector<2x8x16xf32>
    %c0_5 = arith.constant 0 : index
    %c0_6 = arith.constant 0 : index
    %c0_7 = arith.constant 0 : index
    %4 = vector.load %arg4[%c0_5, %c0_6, %c0_7] : memref<1x8x1xf32, #tpu.memory_space<vmem>>, vector<1x8x1xf32>
    %5 = vector.broadcast %4 : vector<1x8x1xf32> to vector<2x8x16xf32>
    %6 = arith.addf %3, %5 : vector<2x8x16xf32>
    %cst = arith.constant 0.000000e+00 : f32
    %7 = vector.broadcast %cst : f32 to vector<2x8x16xf32>
    %8 = arith.maximumf %6, %7 : vector<2x8x16xf32>
    %c0_8 = arith.constant 0 : index
    %c0_9 = arith.constant 0 : index
    %c0_10 = arith.constant 0 : index
    %9 = vector.load %arg5[%c0_8, %c0_9, %c0_10] : memref<2x8x16xf32, #tpu.memory_space<vmem>>, vector<2x8x16xf32>
    tpu.vector_store %arg5[%c0_8, %c0_9, %c0_10], %8 {strides = array<i32>} : memref<2x8x16xf32, #tpu.memory_space<vmem>>, vector<2x8x16xf32>,
    return
  }
  func.func @transform_0(%arg0: i32, %arg1: i32) -> (i32, i32, i32) {
    %c0_i32 = arith.constant 0 : i32
    %c0_i32_0 = arith.constant 0 : i32
    return %arg0, %c0_i32, %arg1 : i32, i32, i32
  }
  func.func @transform_1(%arg0: i32, %arg1: i32) -> (i32, i32, i32) {
    %c0_i32 = arith.constant 0 : i32
    %c0_i32_0 = arith.constant 0 : i32
    %c0_i32_1 = arith.constant 0 : i32
    %c0_i32_2 = arith.constant 0 : i32
    return %c0_i32, %c0_i32_0, %c0_i32_1 : i32, i32, i32
  }
  func.func @transform_2(%arg0: i32, %arg1: i32) -> (i32, i32, i32) {
    %c0_i32 = arith.constant 0 : i32
    %c0_i32_0 = arith.constant 0 : i32
    %c0_i32_1 = arith.constant 0 : i32
    %c0_i32_2 = arith.constant 0 : i32
    return %c0_i32, %c0_i32_0, %c0_i32_1 : i32, i32, i32
  }
  func.func @transform_3(%arg0: i32, %arg1: i32) -> (i32, i32, i32) {
    %c0_i32 = arith.constant 0 : i32
    %c0_i32_0 = arith.constant 0 : i32
    return %arg0, %c0_i32, %arg1 : i32, i32, i32
  }
}

</mosaic_0001>

<bundles_post_ra>
// kernel: mask_conv_block_1d.3
= control target key start
LH: loop header
LB: loop body
LE: loop exit
PB: predicated region body
PF: predicated region fallthrough
CT: control target
= control target key end

     0   :  { %s388_s12 = smov 0   ;;  %s390_s13 = smov 0   ;;  %s427_s0 = inlined_call_operand.vmem [shape: f32[4,8,16], index: 0, kind: input, shape index: {}, may-alias: {0,3}]   ;;  %s428_s1 = inlined_call_operand.vmem [shape: f32[1,8,1], index: 1, kind: input, shape index: {}]   ;;  %s429_s2 = inlined_call_operand.vmem [shape: f32[1,8,1], index: 2, kind: input, shape index: {}]   ;;  %s430_s3 = inlined_call_operand.vmem [shape: f32[4,8,16], index: 3, kind: output, shape index: {}, may-alias: {0,3}]  }
   0x1   :  { %s392_s14 = smov 0  }
   0x2 LB: > { %s25_s15 = sadd.s32 1, %s361_s13  ;;  %p310_p0 = scmp.ge.s32.totalorder %s365_s14, 1  ;;  %s365_s14 = sphi %s392_s14, %s13_s14   ;;  %s361_s13 = sphi %s390_s13, %s432_s13   ;;  %s357_s12 = sphi %s388_s12, %s431_s12  }
   0x3   : > { %p27_p1 = scmp.ge.s32.totalorder %s25_s15, 2  ;;  %p157_p2 = scmp.lt.s32.totalorder %s365_s14, 3 }
   0x5   : > { %s434_s15 = smov (%p27_p1, %s25_s15), 0  ;;  %p158_p3 = pnand %p310_p0, %p157_p2 }
   0x6   : > { %v207_v0 = vld [vmem:[%s428_s1] sm:$0xff] (!%p158_p3)  ;;  %v367_v1 = vmov (!%p158_p3), 0   ;;  %s311_s20 = sshll.u32 (!%p158_p3), %s357_s12, 1  ;;  %vm225_vm0 = vcmask (!%p158_p3), 130048  }
   0x7   : > { %161 = sbr.rel (%p158_p3) target bundleno = 145 (0x91), region = 32  ;;  %342 = vset.pattern.permute.xlu0 (!%p158_p3), %v367_v1  ;;  %v215_v2 = vld [vmem:[%s429_s2] sm:$0xff] (!%p158_p3)  ;;  %p188_p4 = scmp.lt.s32.totalorder (!%p158_p3), %s311_s20, 3 }
   0x8   : > { %210 = vperm.xlu0 (!%p158_p3), %342, %v207_v0  }
   0xc   : > { %218 = vperm.xlu0 (!%p158_p3), %342, %v215_v2  }
   0xe   : > { %s436_s20 = smov (!%p188_p4, %s311_s20), 3 }
   0xf   : > { %s312_s21 = sshll.u32 %s436_s20, 3 }
  0x10   : > { %s194_s24 = scalar_lea.vmem %s427_s0, %s312_s21  ;;  %s203_s27 = scalar_lea.vmem %s430_s3, %s312_s21 }
  0x11   : > { %v205_v4 = vld [vmem:[%s194_s24] sm:$0xff]  ;;  %v206_v5 = vld [vmem:[%s194_s24 + $0x8] sm:$0xff] }
  0x87   : > { %v211_v3 = vpop.permute.xlu0 %210 }
  0x88   : > { %v213_v6 = vmul.f32 %v211_v3, %v205_v4  ;;  %v214_v7 = vmul.f32 %v211_v3, %v206_v5 }
  0x8b   : > { %v219_v8 = vpop.permute.xlu0 %218 }
  0x8c   : > { %v221_v9 = vadd.f32 %v219_v8, %v213_v6  ;;  %v222_v10 = vadd.f32 %v219_v8, %v214_v7 }
  0x8e   : > { %v223_v11 = vmax.f32 %v221_v9, 0.0  ;;  %v224_v12 = vmax.f32 %v222_v10, 0.0 }
  0x90   : > { %226 = vst.msk [vmem:[%s203_s27] sm:$0xff] %vm225_vm0, %v223_v11  ;;  %227 = vst.msk [vmem:[%s203_s27 + $0x8] sm:$0xff] %vm225_vm0, %v224_v12 }
  0x91 PF: > { %s13_s14 = sadd.s32 1, %s365_s14   ;;  %s431_s12 = smov %s361_s13 }
  0x92   : > { %p10_p5 = scmp.ge.s32.totalorder %s13_s14, 4   ;;  %s432_s13 = smov %s434_s15 }
  0x94   :  { %12 = sbr.rel (!%p10_p5) target bundleno = 2 (0x2), region = 62 }

// kernel: mask_conv_block_1d.2
= control target key start
LH: loop header
LB: loop body
LE: loop exit
PB: predicated region body
PF: predicated region fallthrough
CT: control target
= control target key end

     0   :  { %s678_s0 = inlined_call_operand.vmem [shape: s32[4], index: 0, kind: input, shape index: {}]   ;;  %s679_s1 = inlined_call_operand.vmem [shape: f32[4,4,16], index: 1, kind: input, shape index: {}]   ;;  %s680_s2 = inlined_call_operand.vmem [shape: f32[8,12], index: 2, kind: input, shape index: {}]   ;;  %s681_s3 = inlined_call_operand.vmem [shape: f32[4,8,16], index: 3, kind: output, shape index: {0}]   ;;  %s682_s4 = inlined_call_operand.vmem [shape: f32[2,8,2], index: 4, kind: output, shape index: {1}]  }
   0x1   :  { %s10_s17 = sshll.u32 %s678_s0, 4  ;;  %s11_s17 = int_to_ptr.vmem [resolvable:$true] %s10_s17 }
   0x2   :  { %s582_s18 = scalar_lea.vmem %s11_s17, 16  ;;  %p587_p1 = scmp.lt.s32.totalorder %s11_s17, %s11_s17 }
   0x3   :  { %p583_p0 = scmp.ne.s32.totalorder %s11_s17, %s582_s18  ;;  %p588_p2 = scmp.lt.s32.totalorder %s582_s18, %s582_s18 }
   0x5   :  { %p589_p3 = por %p588_p2, %p587_p1 }
   0x7   :  { %p590_p4 = pnand %p589_p3, %p583_p0 }
   0x9   :  { %593 = shalt.err (!%p590_p4)  }
   0xa   :  { %s604_s19 = smov [#allocation4]  }
   0xb   :  { %13 = dma.vmem_to_smem %s11_s17, 16, %s604_s19, [#allocation3] }
   0xc   :  { %598 = dma.done.wait [#allocation3], 16 }
   0xd   :  { %599 = vsyncadd [#allocation3], 4294967280 }
   0xe   :  { %15 = sfence }
   0xf   :  { %s640_s20 = smov 0  }
  0x10 LB: > { %s646_s0 = sadd.s32 4294967295, %s602_s20   ;;  %p512_p5 = scmp.ge.s32.totalorder %s602_s20, 1  ;;  %s602_s20 = sphi %s640_s20, %s21_s20  }
  0x11   : > { %p148_p6 = scmp.lt.s32.totalorder %s602_s20, 3 }
  0x13   : > { %p149_p7 = pnand %p512_p5, %p148_p6 }
  0x14   : > { %s513_s21 = sshll.u32 (!%p149_p7), %s646_s0, 1  ;;  %v197_v0 = vlaneseq (!%p149_p7)  ;;  %vm192_vm0 = vcmask (!%p149_p7), 3072   ;;  %vm194_vm1 = vcmask (!%p149_p7), 142472   ;;  %v605_v1 = vmov (!%p149_p7), 0.0   ;;  %s606_s29 = smov (!%p149_p7), 1   ;;  %v196_v28 = vld [vmem:[%s680_s2] sm:$0xff] (!%p149_p7) }
  0x15   : > { %152 = sbr.rel (%p149_p7) target bundleno = 808 (0x328), region = 28  ;;  %p177_p8 = scmp.lt.s32.totalorder (!%p149_p7), %s513_s21, 3  ;;  %193 = vst.msk [vmem:[#allocation2] sm:$0xf] (!%p149_p7), %vm192_vm0, %v605_v1  ;;  %vm209_vm4 = vcmask (!%p149_p7), 134152   ;;  %v607_v12 = vmov (!%p149_p7), 0.0|0.0  }
  0x16   : > { %s200_s22 = sld [smem:[#allocation4 + %s513_s21]] (!%p149_p7)  ;;  %s303_s23 = sadd.s32 (!%p149_p7), 1, %s513_s21  ;;  %195 = vst.msk [vmem:[#allocation2] sm:$0xf] (!%p149_p7), %vm194_vm1, %v605_v1  ;;  %v198_v2 = vand.u32 (!%p149_p7), 127, %v197_v0  ;;  %548 = vmatprep.subr.bf16.mxu0 (!%p149_p7), %v607_v12  ;;  %552 = vmatprep.subr.bf16.mxu1 (!%p149_p7), %v607_v12  ;;  %vm608_vm5 = vmmov (!%p149_p7), 0  }
  0x17   : > { %s304_s24 = sld [smem:[#allocation4 + %s303_s23]] (!%p149_p7)  ;;  %538 = vmatprep.mubr.msk.f32.mxu0 (!%p149_p7), %vm608_vm5, %v605_v1  ;;  %545 = vmatprep.mubr.msk.f32.mxu1 (!%p149_p7), %vm608_vm5, %v605_v1  ;;  %s609_s30 = smov (!%p149_p7), 127   ;;  %vm219_vm6 = vcmask (!%p149_p7), 1043456   ;;  %vm611_vm7 = vmmov (!%p149_p7), 1   ;;  %vm221_vm9 = vcmask (!%p149_p7), 97280   ;;  %vm297_vm10 = vcmask (!%p149_p7), 130048  }
  0x18   : > { %s610_s5 = smov (!%p149_p7), 126   ;;  %vm550_vm8 = vmpackc.low (!%p149_p7), %vm219_vm6, %vm611_vm7  ;;  %p188_p9 = scmp.lt.s32.totalorder (!%p149_p7), %s646_s0, 1  ;;  %vm417_vm11 = vcmask (!%p149_p7), 7168   ;;  %vm419_vm12 = vcmask (!%p149_p7), 15360  }
  0x1c   : > { %s684_s21 = smov (!%p177_p8, %s513_s21), 3  ;;  %v201_v3 = vstv %s200_s22  ;;  %s686_s0 = smov (!%p188_p9, %s646_s0), 1 }
  0x1d   : > { %s514_s25 = sshll.u32 %s684_s21, 2  ;;  %vm202_vm2 = vcmp.lt.s32.totalorder %v198_v2, %v201_v3  ;;  %v305_v7 = vstv %s304_s24  ;;  %s516_s8 = sshll.u32 %s684_s21, 3 }
  0x1e   : > { %s180_s28 = scalar_lea.vmem %s679_s1, %s514_s25  ;;  %vm306_vm3 = vcmp.lt.s32.totalorder %v198_v2, %v305_v7  ;;  %s186_s11 = scalar_lea.vmem %s681_s3, %s516_s8 }
  0x1f   : > { %v203_v4 = vld [vmem:[%s180_s28] sm:$0xf]  ;;  %v521_v6 = vld [vmem:[%s180_s28 + $0x4] sm:$0xf]  ;;  %s517_s12 = sshll.u32 %s686_s0, 3 }
  0x20   : > { %v204_v5 = vsel %vm202_vm2, %v203_v4, 0.0  ;;  %v309_v8 = vsel %vm306_vm3, %v521_v6, 0.0  ;;  %s191_s15 = scalar_lea.vmem %s682_s4, %s517_s12 }
  0x21   : > { %206 = vrot.lane.b32.xlu0 %v204_v5, %s606_s29 }
  0x25   : > { %311 = vrot.lane.b32.xlu0 %v309_v8, %s606_s29 }
  0x93   : > { %v207_v9 = vpop.permute.xlu0 %206 }
  0x94   : > { %210 = vst.msk [vmem:[#allocation2] sm:$0xf] %vm209_vm4, %v207_v9 }
  0x97   : > { %v312_v10 = vpop.permute.xlu0 %311 }
  0x9b   : > { %v211_v11 = vld [vmem:[#allocation2] sm:$0xf] }
  0x9c   : > { %314 = vst.msk [vmem:[#allocation2] sm:$0xf] %vm209_vm4, %v312_v10  ;;  %v213_v14 = vrot.slane %v211_v11, 4 }
  0xa3   : > { %v315_v13 = vld [vmem:[#allocation2] sm:$0xf] }
  0xa4   : > { %v317_v15 = vrot.slane %v315_v13, 4  ;;  %v577_v17 = vpack.i.bf16 %v315_v13, %v211_v11 }
  0xa6   : > { %v572_v16 = vpack.i.bf16 %v317_v15, %v213_v14 }
  0xa8   : > { %573 = vrot.lane.b32.xlu1 %v572_v16, %s609_s30 }
  0xac   : > { %578 = vrot.lane.b32.xlu1 %v577_v17, %s610_s5 }
 0x11a   : > { %v574_v18 = vpop.permute.xlu1 %573 }
 0x11b   : > { %v576_v19 = vunpack.i.h.bf16 %v574_v18  ;;  %v575_v20 = vunpack.i.l.bf16 %v574_v18 }
 0x11d   : > { %v220_v24 = vsel %vm219_vm6, %v211_v11, %v575_v20  ;;  %v323_v25 = vsel %vm219_vm6, %v315_v13, %v576_v19 }
 0x11e   : > { %v579_v21 = vpop.permute.xlu1 %578 }
 0x11f   : > { %v581_v22 = vunpack.i.h.bf16 %v579_v21  ;;  %v580_v23 = vunpack.i.l.bf16 %v579_v21 }
 0x121   : > { %v549_v26 = vpack.c.bf16 %v580_v23, %v220_v24  ;;  %v553_v27 = vpack.c.bf16 %v581_v22, %v323_v25 }
 0x123   : > { %551 = vmatpush3.bf16.msk.msra.mxu0 %vm550_vm8, %v549_v26  ;;  %555 = vmatpush3.bf16.msk.msra.mxu1 %vm550_vm8, %v553_v27 }
 0x126   : > { %539 = vmatmul.mubr.msk.f32.vlgmr.msra.gmra.mrb[0].mxu0 %vm221_vm9, %v196_v28  ;;  %546 = vmatmul.mubr.msk.f32.vlgmr.msra.gmra.mrb[0].mxu1 %vm221_vm9, %v196_v28 }
 0x1f9   : > { %v293_v29 = vpop.f32.mrb[0].mxu0  ;;  %v392_v30 = vpop.f32.mrb[0].mxu1 }
 0x1fa   : > { %298 = vst.msk [vmem:[%s186_s11] sm:$0xff] %vm297_vm10, %v293_v29  ;;  %v540_v31 = vpop.f32.mrb[1].mxu0  ;;  %v547_v32 = vpop.f32.mrb[1].mxu1  ;;  %v398_v33 = vsel %vm297_vm10, %v392_v30, 0.0  ;;  %v299_v34 = vsel %vm297_vm10, %v293_v29, 0.0  ;;  %524 = vst.msk [vmem:[%s186_s11 + $0x8] sm:$0xff] %vm297_vm10, %v392_v30 }
 0x1fb   : > { %399 = vadd.xlane.f32.xlu1 %v398_v33  ;;  %300 = vadd.xlane.f32.xlu0 %v299_v34 }
 0x201   : > { %v403_v39 = vld [vmem:[%s186_s11] sm:$0xff]  ;;  %v525_v40 = vld [vmem:[%s186_s11 + $0x8] sm:$0xff] }
 0x288   : > { %v400_v35 = vpop.xlane.xlu1 %399  ;;  %v301_v36 = vpop.xlane.xlu0 %300 }
 0x289   : > { %v401_v37 = vadd.f32 %v400_v35, %v301_v36 }
 0x28b   : > { %v402_v38 = vmul.f32 0.03125, %v401_v37 }
 0x28d   : > { %v404_v41 = vsub.f32 %v403_v39, %v402_v38  ;;  %v411_v42 = vsub.f32 %v525_v40, %v402_v38 }
 0x28f   : > { %v405_v43 = vmul.f32 %v404_v41, %v404_v41  ;;  %v412_v45 = vmul.f32 %v411_v42, %v411_v42 }
 0x291   : > { %v406_v44 = vsel %vm297_vm10, %v405_v43, 0.0  ;;  %v413_v46 = vsel %vm297_vm10, %v412_v45, 0.0 }
 0x292   : > { %407 = vadd.xlane.f32.xlu0 %v406_v44 }
 0x296   : > { %414 = vadd.xlane.f32.xlu0 %v413_v46 }
 0x31f   : > { %v408_v47 = vpop.xlane.xlu0 %407 }
 0x323   : > { %v415_v48 = vpop.xlane.xlu0 %414 }
 0x324   : > { %v416_v49 = vadd.f32 %v415_v48, %v408_v47 }
 0x326   : > { %v418_v50 = vsel %vm417_vm11, %v401_v37, %v416_v49 }
 0x327   : > { %420 = vst.msk [vmem:[%s191_s15] sm:$0xff] %vm419_vm12, %v418_v50 }
 0x328 PF: > { %s21_s20 = sadd.s32 1, %s602_s20  }
 0x329   : > { %p18_p10 = scmp.ge.s32.totalorder %s21_s20, 4  }
 0x32b   :  { %20 = sbr.rel (!%p18_p10) target bundleno = 16 (0x10), region = 72 }

</bundles_post_ra>
